<compile_context>
chip_gen: v6e
topology: v6e:2x2x1
jax: 0.10.0
libtpu: 0.0.40
codegen_flags: <defaults>
</compile_context>

<pallas_src>
import functools

import jax
import jax.numpy as jnp
from jax.experimental import pallas as pl
from jax.experimental.pallas import tpu as pltpu

LEAKY_SLOPE = 0.01
BN_EPS = 1e-5
LANE = 128


def _rup(x, m):
    return (x + m - 1) // m * m


def _derive_vmem_limit():
    # Per-generation VMEM ceiling (v5e/v6e: 128 MiB, v7x: 64 MiB per core).
    try:
        cap = int(pltpu.get_tpu_info().vmem_capacity_bytes)
    except Exception:
        cap = 64 * 1024 * 1024
    return int(min(cap * 3 // 4, 96 * 1024 * 1024))


VMEM_LIMIT = _derive_vmem_limit()


# ----------------------------------------------------------------------------
# Row-tile selection (trace-time only)
# ----------------------------------------------------------------------------
def _pick_row_tile(h, wd, cin, coutp, k, row_cap=None):
    """Largest divisor of H whose per-step VMEM footprint fits the budget."""
    p = k // 2
    wp_ = wd + 2 * p
    limit = int(VMEM_LIMIT * 0.7)
    cap = h if row_cap is None else max(1, min(h, row_cap))
    wt = 2 * k * _rup(k * cin, 8) * coutp * 2          # weight panel (bf16, x2 buf)
    best = 1
    for th in range(1, cap + 1):
        if h % th:
            continue
        bh = th + 2 * p
        inb = 2 * bh * _rup(wp_, 8) * _rup(cin, LANE) * 2   # input block (x2 buf)
        scr = bh * _rup(wp_, 8) * _rup(cin, LANE) * 2       # affine scratch
        outb = 2 * th * _rup(wd, 8) * coutp * 2             # output block (x2 buf)
        acc = th * wd * coutp * 4                           # f32 accumulator
        if wt + inb + scr + outb + acc <= limit:
            best = th
    return best


def _pick_pool_tile(ho, wd, c, row_cap=None):
    cap = ho if row_cap is None else max(1, min(ho, row_cap))
    budget = 8 * 1024 * 1024
    per = 2 * 2 * _rup(wd, 8) * _rup(c, LANE) * 2
    best = 1
    for t in range(1, cap + 1):
        if ho % t == 0 and t * per <= budget:
            best = t
    return best


# ----------------------------------------------------------------------------
# Pallas kernels
# ----------------------------------------------------------------------------
def _conv_kernel(*refs, k, pad, th, hh, ww, coutp, with_bn, with_stats,
                 apply_relu):
    """Direct conv: one (batch, row-tile) step with a single Cout panel.

    refs = x, w, b, [scale, shift], o, [sum, sq], xs_scratch
    x block: (1, 1, th+2p, Wp, Cin) zero-padded activation (bf16)
    w block: (k, k*Cin, Coutp)  -- taps grouped by kernel row
    """
    x_ref, w_ref, b_ref = refs[0], refs[1], refs[2]
    pos = 3
    if with_bn:
        s_ref, t_ref = refs[3], refs[4]
        pos = 5
    o_ref = refs[pos]
    pos += 1
    if with_stats:
        sum_ref, sq_ref = refs[pos], refs[pos + 1]
        pos += 2
    xs_ref = refs[pos]

    hi = pl.program_id(1)
    bh, wp_, cin = xs_ref.shape

    xv = x_ref[...].reshape(bh, wp_, cin)
    if with_bn:
        # Fold the producer BatchNorm's scale*x+shift into the input load.
        # The shift is masked to the interior so the conv's zero padding
        # semantics stay exact (padding pads the BN output with zeros).
        sc = s_ref[...].reshape(1, 1, cin).astype(jnp.float32)
        sh = t_ref[...].reshape(1, 1, cin).astype(jnp.float32)
        xf = xv.astype(jnp.float32) * sc
        if pad > 0:
            r0 = hi * th
            rows = jax.lax.broadcasted_iota(jnp.int32, (bh, wp_), 0) + r0
            cols = jax.lax.broadcasted_iota(jnp.int32, (bh, wp_), 1)
            inside = ((rows >= pad) & (rows < pad + hh)
                      & (cols >= pad) & (cols < pad + ww))
            xf = xf + sh * inside.astype(jnp.float32)[:, :, None]
        else:
            xf = xf + sh
        xv = xf.astype(jnp.bfloat16)
    xs_ref[...] = xv

    acc = jnp.zeros((th * ww, coutp), jnp.float32)
    for di in range(k):
        parts = [xs_ref[di:di + th, dj:dj + ww, :] for dj in range(k)]
        lhs = parts[0] if k == 1 else jnp.concatenate(parts, axis=-1)
        lhs = lhs.reshape(th * ww, k * cin)
        acc = acc + jnp.dot(lhs, w_ref[di], preferred_element_type=jnp.float32)

    y = acc + b_ref[...]
    if apply_relu:
        y = jnp.where(y >= 0.0, y, LEAKY_SLOPE * y)
    o_ref[...] = y.reshape(1, th, ww, coutp).astype(o_ref.dtype)

    if with_stats:
        s = jnp.sum(y, axis=0).reshape(1, 1, coutp)
        q = jnp.sum(y * y, axis=0).reshape(1, 1, coutp)

        @pl.when(hi == 0)
        def _init():
            sum_ref[...] = s
            sq_ref[...] = q

        @pl.when(hi > 0)
        def _acc():
            sum_ref[...] = sum_ref[...] + s
            sq_ref[...] = sq_ref[...] + q


def _maxpool_kernel(x_ref, *out_refs, with_stats):
    # x block: (1, 2*tho, W, C) dense NHWC; 2x2 reduction done in-kernel.
    o_ref = out_refs[0]
    xb = x_ref[...]
    _, h2, wd, c = xb.shape
    tho, wo = h2 // 2, wd // 2
    a = jnp.max(xb.reshape(1, tho, 2, wd, c), axis=2)
    y = jnp.max(a.reshape(1, tho, wo, 2, c), axis=3)
    o_ref[...] = y.astype(o_ref.dtype)

    if with_stats:
        yf = y.astype(jnp.float32)
        s = jnp.sum(yf, axis=(1, 2)).reshape(1, 1, c)
        q = jnp.sum(yf * yf, axis=(1, 2)).reshape(1, 1, c)
        hi = pl.program_id(1)

        @pl.when(hi == 0)
        def _init():
            out_refs[1][...] = s
            out_refs[2][...] = q

        @pl.when(hi > 0)
        def _acc():
            out_refs[1][...] = out_refs[1][...] + s
            out_refs[2][...] = out_refs[2][...] + q


# ----------------------------------------------------------------------------
# Wrappers
# ----------------------------------------------------------------------------
def conv2d(x, w, b, *, scale=None, shift=None, apply_relu=True,
           with_stats=False, row_cap=None):
    """x: (N,H,W,Cin) bf16; w: (k,k,Cin,Coutp) f32; b: (Coutp,) f32.
    Optional scale/shift (1,Cin): producer BatchNorm folded into the input."""
    n, h, wd, cin = x.shape
    k = int(w.shape[0])
    coutp = int(w.shape[3])
    assert int(w.shape[2]) == cin
    p = k // 2
    wp_ = wd + 2 * p

    th = _pick_row_tile(h, wd, cin, coutp, k, row_cap)
    nh = h // th
    bh = th + 2 * p

    xb = x.astype(jnp.bfloat16)
    xpd = jnp.pad(xb, ((0, 0), (p, p), (p, p), (0, 0))) if p else xb
    if nh == 1:
        xt = xpd.reshape(n, 1, bh, wp_, cin)
    elif p == 0:
        xt = xpd.reshape(n, nh, bh, wp_, cin)
    else:
        # Halo'd row tiles (only ~ (th+2p)/th extra bytes; no k*k im2col).
        xt = jnp.stack([xpd[:, i * th:i * th + bh] for i in range(nh)], axis=1)

    w2 = w.reshape(k, k * cin, coutp).astype(jnp.bfloat16)
    b2 = b.reshape(1, coutp).astype(jnp.float32)
    with_bn = scale is not None

    inputs = [xt, w2, b2]
    in_specs = [
        pl.BlockSpec((1, 1, bh, wp_, cin), lambda ni, hi: (ni, hi, 0, 0, 0)),
        pl.BlockSpec((k, k * cin, coutp), lambda ni, hi: (0, 0, 0)),
        pl.BlockSpec((1, coutp), lambda ni, hi: (0, 0)),
    ]
    if with_bn:
        inputs += [jnp.reshape(scale, (1, cin)).astype(jnp.float32),
                   jnp.reshape(shift, (1, cin)).astype(jnp.float32)]
        in_specs += [pl.BlockSpec((1, cin), lambda ni, hi: (0, 0))] * 2

    out_shape = [jax.ShapeDtypeStruct((n, h, wd, coutp), jnp.bfloat16)]
    out_specs = [pl.BlockSpec((1, th, wd, coutp), lambda ni, hi: (ni, hi, 0, 0))]
    if with_stats:
        out_shape += [jax.ShapeDtypeStruct((n, 1, coutp), jnp.float32)] * 2
        out_specs += [pl.BlockSpec((1, 1, coutp), lambda ni, hi: (ni, 0, 0))] * 2

    kernel = functools.partial(
        _conv_kernel, k=k, pad=p, th=th, hh=h, ww=wd, coutp=coutp,
        with_bn=with_bn, with_stats=with_stats, apply_relu=apply_relu)

    cost = pl.CostEstimate(
        flops=2 * n * h * wd * (k * k * cin) * coutp,
        transcendentals=0,
        bytes_accessed=int(xt.size * 2 + w2.size * 2 + n * h * wd * coutp * 2))

    res = pl.pallas_call(
        kernel,
        grid=(n, nh),
        in_specs=in_specs,
        out_specs=out_specs if with_stats else out_specs[0],
        out_shape=out_shape if with_stats else out_shape[0],
        scratch_shapes=[pltpu.VMEM((bh, wp_, cin), jnp.bfloat16)],
        compiler_params=pltpu.CompilerParams(
            dimension_semantics=(("parallel", "arbitrary") if with_stats
                                 else ("parallel", "parallel")),
            vmem_limit_bytes=VMEM_LIMIT),
        cost_estimate=cost,
    )(*inputs)

    if with_stats:
        y, ps, pq = res
        return y, jnp.sum(ps, axis=0), jnp.sum(pq, axis=0)  # (1, coutp) each
    return res


def maxpool2x2(x, *, with_stats=True, row_cap=None):
    n, h, wd, c = x.shape
    ho, wo = h // 2, wd // 2
    tho = _pick_pool_tile(ho, wd, c, row_cap)
    grid = (n, ho // tho)

    in_specs = [pl.BlockSpec((1, 2 * tho, wd, c), lambda ni, hi: (ni, hi, 0, 0))]
    out_shape = [jax.ShapeDtypeStruct((n, ho, wo, c), jnp.bfloat16)]
    out_specs = [pl.BlockSpec((1, tho, wo, c), lambda ni, hi: (ni, hi, 0, 0))]
    if with_stats:
        out_shape += [jax.ShapeDtypeStruct((n, 1, c), jnp.float32)] * 2
        out_specs += [pl.BlockSpec((1, 1, c), lambda ni, hi: (ni, 0, 0))] * 2

    res = pl.pallas_call(
        functools.partial(_maxpool_kernel, with_stats=with_stats),
        grid=grid,
        in_specs=in_specs,
        out_specs=out_specs if with_stats else out_specs[0],
        out_shape=out_shape if with_stats else out_shape[0],
        compiler_params=pltpu.CompilerParams(
            dimension_semantics=(("parallel", "arbitrary") if with_stats
                                 else ("parallel", "parallel")),
            vmem_limit_bytes=VMEM_LIMIT),
    )(x.astype(jnp.bfloat16))

    if with_stats:
        y, ps, pq = res
        return y, jnp.sum(ps, axis=0), jnp.sum(pq, axis=0)
    return res


def bn_affine_from_stats(ssum, ssq, count, gamma, beta):
    """Train-mode BatchNorm (biased variance) -> per-channel scale/shift."""
    mean = ssum / float(count)
    var = jnp.maximum(ssq / float(count) - mean * mean, 0.0)
    inv = jax.lax.rsqrt(var + BN_EPS)
    scale = gamma.reshape(1, -1) * inv
    shift = beta.reshape(1, -1) - mean * scale
    return scale, shift


# ----------------------------------------------------------------------------
# Parameters (deterministic, synthetic, true PyTorch shapes)
# ----------------------------------------------------------------------------
_CONV_DEFS = {
    "conv1_1": (3, 3, 64), "conv1_2": (3, 64, 64),
    "conv2_1": (3, 64, 128), "conv2_2": (3, 128, 128),
    "conv3_1": (3, 128, 256), "conv3_2": (3, 256, 256),
    "conv3_3": (3, 256, 256), "conv3_4": (3, 256, 256),
    "conv4_1": (3, 256, 512), "conv4_2": (3, 512, 512),
    "conv4_3": (3, 512, 256), "conv4_4": (3, 256, 256),
    "conv4_5": (3, 256, 256), "conv4_6": (3, 256, 256),
    "conv4_7": (3, 256, 128),
    "conv5_1": (1, 128, 512), "conv5_2": (1, 512, 21),
    "conv6_1": (7, 149, 128), "conv6_2": (7, 128, 128),
    "conv6_3": (7, 128, 128), "conv6_4": (7, 128, 128),
    "conv6_5": (7, 128, 128), "conv6_6": (1, 128, 128),
    "conv6_7": (1, 128, 21),
    "conv7_1": (7, 149, 128), "conv7_2": (7, 128, 128),
    "conv7_3": (7, 128, 128), "conv7_4": (7, 128, 128),
    "conv7_5": (7, 128, 128), "conv7_6": (1, 128, 128),
    "conv7_7": (1, 128, 21),
}

_BN_DEFS = {
    "bn1_1": 64, "bn1_2": 64, "bn2_1": 128, "bn2_2": 128,
    "bn3_1": 256, "bn3_2": 256, "bn3_3": 256, "bn3_4": 256,
    "bn4_1": 256, "bn4_2": 256, "bn4_3": 256,
    "bn6_1": 128, "bn6_2": 128, "bn6_3": 128, "bn6_4": 128, "bn6_5": 128,
    "bn7_1": 128, "bn7_2": 128, "bn7_3": 128, "bn7_4": 128,
}


def init_params(key):
    params = {}
    for i, (name, (k, cin, cout)) in enumerate(sorted(_CONV_DEFS.items())):
        wkey = jax.random.fold_in(key, i)
        bkey = jax.random.fold_in(wkey, 1)
        params[name] = {
            "w": 0.05 * jax.random.normal(wkey, (k, k, cin, cout), jnp.float32),
            "b": 0.05 * jax.random.normal(bkey, (cout,), jnp.float32),
        }
    for name, c in _BN_DEFS.items():
        params[name] = {"gamma": jnp.ones((c,), jnp.float32),
                        "beta": jnp.zeros((c,), jnp.float32)}
    return params


# ----------------------------------------------------------------------------
# Forward pass (mirrors CPM2DPose.forward)
# ----------------------------------------------------------------------------
def cpm2dpose_forward(params, x_nchw):
    def prep(name):
        k, cin, cout = _CONV_DEFS[name]
        if name in ("conv6_1", "conv7_1"):
            # input is concat(scoremap[pad128], encoding[128]) -> 256 slots.
            cinp, slots = 256, [(0, 21, 0), (21, 128, 128)]
        elif cin == 3:
            cinp, slots = 3, [(0, 3, 0)]
        else:
            cinp, slots = _rup(cin, LANE), [(0, cin, 0)]
        coutp = _rup(cout, LANE)
        w = params[name]["w"]
        b = params[name]["b"]
        wp = jnp.zeros((k, k, cinp, coutp), jnp.float32)
        for (src, ln, dst) in slots:
            wp = wp.at[:, :, dst:dst + ln, :cout].set(w[:, :, src:src + ln, :])
        bp = jnp.zeros((coutp,), jnp.float32).at[:cout].set(b)
        return wp, bp

    def conv(name, x, bn=None, relu=True, stats=False):
        wp, bp = prep(name)
        scale, shift = (None, None) if bn is None else bn
        return conv2d(x, wp, bp, scale=scale, shift=shift,
                      apply_relu=relu, with_stats=stats)

    def bn_from(name, ssum, ssq, count):
        cp = ssum.shape[-1]
        g = params[name]["gamma"]
        bt = params[name]["beta"]
        gp = jnp.zeros((cp,), jnp.float32).at[:g.shape[0]].set(g)
        btp = jnp.zeros((cp,), jnp.float32).at[:bt.shape[0]].set(bt)
        return bn_affine_from_stats(ssum, ssq, count, gp, btp)

    x = jnp.transpose(x_nchw, (0, 2, 3, 1)).astype(jnp.bfloat16)   # NCHW -> NHWC
    n, h, wd, _ = x.shape

    # ---- block 1
    y, s, q = conv("conv1_1", x, stats=True)
    bn = bn_from("bn1_1", s, q, n * h * wd)
    y = conv("conv1_2", y, bn)
    y, s, q = maxpool2x2(y)
    h, wd = h // 2, wd // 2
    bn = bn_from("bn1_2", s, q, n * h * wd)

    # ---- block 2
    y, s, q = conv("conv2_1", y, bn, stats=True)
    bn = bn_from("bn2_1", s, q, n * h * wd)
    y = conv("conv2_2", y, bn)
    y, s, q = maxpool2x2(y)
    h, wd = h // 2, wd // 2
    bn = bn_from("bn2_2", s, q, n * h * wd)

    # ---- block 3
    y, s, q = conv("conv3_1", y, bn, stats=True)
    bn = bn_from("bn3_1", s, q, n * h * wd)
    y, s, q = conv("conv3_2", y, bn, stats=True)
    bn = bn_from("bn3_2", s, q, n * h * wd)
    y, s, q = conv("conv3_3", y, bn, stats=True)
    bn = bn_from("bn3_3", s, q, n * h * wd)
    y = conv("conv3_4", y, bn)
    y, s, q = maxpool2x2(y)
    h, wd = h // 2, wd // 2
    bn = bn_from("bn3_4", s, q, n * h * wd)

    # ---- block 4
    y = conv("conv4_1", y, bn)
    y = conv("conv4_2", y)
    y, s, q = conv("conv4_3", y, stats=True)
    bn = bn_from("bn4_1", s, q, n * h * wd)
    y, s, q = conv("conv4_4", y, bn, stats=True)
    bn = bn_from("bn4_2", s, q, n * h * wd)
    y, s, q = conv("conv4_5", y, bn, stats=True)
    bn = bn_from("bn4_3", s, q, n * h * wd)
    y = conv("conv4_6", y, bn)
    encoding = conv("conv4_7", y)

    y = conv("conv5_1", encoding)
    scoremap = conv("conv5_2", y, relu=False)

    # ---- stage 6
    y = jnp.concatenate([scoremap, encoding], axis=-1)   # 128(pad of 21) + 128
    y, s, q = conv("conv6_1", y, stats=True)
    bn = bn_from("bn6_1", s, q, n * h * wd)
    y, s, q = conv("conv6_2", y, bn, stats=True)
    bn = bn_from("bn6_2", s, q, n * h * wd)
    y, s, q = conv("conv6_3", y, bn, stats=True)
    bn = bn_from("bn6_3", s, q, n * h * wd)
    y, s, q = conv("conv6_4", y, bn, stats=True)
    bn = bn_from("bn6_4", s, q, n * h * wd)
    y, s, q = conv("conv6_5", y, bn, stats=True)
    bn = bn_from("bn6_5", s, q, n * h * wd)
    y = conv("conv6_6", y, bn)
    scoremap = conv("conv6_7", y, relu=False)

    # ---- stage 7
    y = jnp.concatenate([scoremap, encoding], axis=-1)
    y, s, q = conv("conv7_1", y, stats=True)
    bn = bn_from("bn7_1", s, q, n * h * wd)
    y, s, q = conv("conv7_2", y, bn, stats=True)
    bn = bn_from("bn7_2", s, q, n * h * wd)
    y, s, q = conv("conv7_3", y, bn, stats=True)
    bn = bn_from("bn7_3", s, q, n * h * wd)
    y = conv("conv7_4", y, bn)
    # TODO(synk): nn.Dropout2d(p=0.1) in train mode randomly zeroes whole
    # channels; modeled here as (eval-mode) identity.
    y, s, q = conv("conv7_5", y, stats=True)
    bn = bn_from("bn7_4", s, q, n * h * wd)
    y = conv("conv7_6", y, bn)
    y = conv("conv7_7", y, relu=False)

    out = y[:, :, :, :21].astype(jnp.float32)
    return jnp.transpose(out, (0, 3, 1, 2))   # NHWC -> NCHW


# ----------------------------------------------------------------------------
# References for self-checks
# ----------------------------------------------------------------------------
def _conv_reference(x, w, b, scale=None, shift=None, relu=True):
    xf = x.astype(jnp.float32)
    if scale is not None:
        xf = xf * scale.reshape(1, 1, 1, -1) + shift.reshape(1, 1, 1, -1)
        xf = xf.astype(jnp.bfloat16).astype(jnp.float32)
    wf = w.astype(jnp.bfloat16).astype(jnp.float32)
    y = jax.lax.conv_general_dilated(
        xf, wf, window_strides=(1, 1), padding="SAME",
        dimension_numbers=("NHWC", "HWIO", "NHWC"))
    y = y + b.reshape(1, 1, 1, -1)
    if relu:
        y = jnp.where(y >= 0.0, y, LEAKY_SLOPE * y)
    return y


# ----------------------------------------------------------------------------
if __name__ == "__main__":
    key = jax.random.PRNGKey(0)

    # --- unit check 1: 3x3 direct conv, halo'd row tiles, fused stats -------
    x1 = jax.random.normal(jax.random.fold_in(key, 1), (2, 16, 16, 3),
                           jnp.float32).astype(jnp.bfloat16)
    w1 = 0.1 * jax.random.normal(jax.random.fold_in(key, 2), (3, 3, 3, 128),
                                 jnp.float32)
    b1 = 0.1 * jax.random.normal(jax.random.fold_in(key, 3), (128,), jnp.float32)

    @jax.jit
    def _t1(x, w, b):
        return conv2d(x, w, b, with_stats=True, row_cap=4)

    y1, s1, q1 = _t1(x1, w1, b1)
    ref1 = _conv_reference(x1, w1, b1)
    assert bool(jnp.allclose(y1.astype(jnp.float32), ref1, rtol=2e-2, atol=5e-2))
    assert bool(jnp.allclose(s1[0], jnp.sum(ref1, axis=(0, 1, 2)),
                             rtol=1e-2, atol=1.0))

    # --- unit check 2: 7x7 direct conv with fused BatchNorm input affine ----
    x2 = jax.random.normal(jax.random.fold_in(key, 4), (2, 16, 16, 128),
                           jnp.float32).astype(jnp.bfloat16)
    w2 = 0.05 * jax.random.normal(jax.random.fold_in(key, 5), (7, 7, 128, 128),
                                  jnp.float32)
    b2 = 0.05 * jax.random.normal(jax.random.fold_in(key, 6), (128,), jnp.float32)
    sc2 = 0.5 + jax.random.uniform(jax.random.fold_in(key, 8), (128,), jnp.float32)
    sh2 = 0.2 * jax.random.normal(jax.random.fold_in(key, 9), (128,), jnp.float32)

    @jax.jit
    def _t2(x, w, b, sc, sh):
        return conv2d(x, w, b, scale=sc, shift=sh, row_cap=8)

    y2 = _t2(x2, w2, b2, sc2, sh2)
    ref2 = _conv_reference(x2, w2, b2, scale=sc2, shift=sh2)
    assert bool(jnp.allclose(y2.astype(jnp.float32), ref2, rtol=3e-2, atol=8e-2))

    # --- unit check 3: maxpool 2x2 with fused per-batch stats ---------------
    x3 = jax.random.normal(jax.random.fold_in(key, 10), (2, 16, 16, 128),
                           jnp.float32).astype(jnp.bfloat16)

    @jax.jit
    def _t3(x):
        return maxpool2x2(x, row_cap=4)

    y3, s3, q3 = _t3(x3)
    ref3 = jnp.max(x3.astype(jnp.float32).reshape(2, 8, 2, 8, 2, 128),
                   axis=(2, 4))
    assert bool(jnp.allclose(y3.astype(jnp.float32), ref3, rtol=1e-3, atol=1e-3))
    assert bool(jnp.allclose(s3[0], jnp.sum(ref3, axis=(0, 1, 2)),
                             rtol=1e-2, atol=1.0))

    # --- full forward --------------------------------------------------------
    params = init_params(jax.random.fold_in(key, 123))
    xin = jax.random.normal(jax.random.fold_in(key, 7), (2, 3, 16, 16),
                            jnp.float32)
    fwd = jax.jit(cpm2dpose_forward)
    out = jax.block_until_ready(fwd(params, xin))

    # 3 maxpools: 16 -> 8 -> 4 -> 2 ; 21 output keypoint channels.
    assert out.shape == (2, 21, 2, 2), out.shape
    assert bool(jnp.all(jnp.isfinite(out)))
    print("KERNEL_OK")
</pallas_src>

<mosaic_0001>
module attributes {stable_mosaic.version = 11 : i64} {
  func.func @_conv_kernel(%arg0: i32, %arg1: i32, %arg2: memref<1x1x6x18x3xbf16, #tpu.memory_space<vmem>>, %arg3: memref<3x9x128xbf16, #tpu.memory_space<vmem>>, %arg4: memref<1x128xf32, #tpu.memory_space<vmem>>, %arg5: memref<1x4x16x128xbf16, #tpu.memory_space<vmem>>, %arg6: memref<1x1x128xf32, #tpu.memory_space<vmem>>, %arg7: memref<1x1x128xf32, #tpu.memory_space<vmem>>, %arg8: memref<6x18x3xbf16, #tpu.memory_space<vmem>>) attributes {dimension_semantics = [#tpu.dimension_semantics<parallel>, #tpu.dimension_semantics<arbitrary>], iteration_bounds = array<i64: 2, 4>, scalar_prefetch = 0 : i64, scratch_operands = 1 : i64, tpu.core_type = #tpu.core_type<tc>, window_params = [{transform_indices = @transform_0, window_bounds = array<i64: 1, 1, 6, 18, 3>}, {pipeline_mode = #tpu.pipeline_mode<synchronous>, transform_indices = @transform_1, window_bounds = array<i64: 3, 9, 128>}, {pipeline_mode = #tpu.pipeline_mode<synchronous>, transform_indices = @transform_2, window_bounds = array<i64: 1, 128>}, {transform_indices = @transform_3, window_bounds = array<i64: 1, 4, 16, 128>}, {transform_indices = @transform_4, window_bounds = array<i64: 1, 1, 128>}, {transform_indices = @transform_5, window_bounds = array<i64: 1, 1, 128>}]} {
    %c0 = arith.constant 0 : index
    %c0_0 = arith.constant 0 : index
    %c0_1 = arith.constant 0 : index
    %c0_2 = arith.constant 0 : index
    %c0_3 = arith.constant 0 : index
    %0 = vector.load %arg2[%c0, %c0_0, %c0_1, %c0_2, %c0_3] : memref<1x1x6x18x3xbf16, #tpu.memory_space<vmem>>, vector<1x1x6x18x3xbf16>
    %1 = vector.shape_cast %0 : vector<1x1x6x18x3xbf16> to vector<6x18x3xbf16>
    %c0_4 = arith.constant 0 : index
    %c0_5 = arith.constant 0 : index
    %c0_6 = arith.constant 0 : index
    %2 = vector.load %arg8[%c0_4, %c0_5, %c0_6] : memref<6x18x3xbf16, #tpu.memory_space<vmem>>, vector<6x18x3xbf16>
    tpu.vector_store %arg8[%c0_4, %c0_5, %c0_6], %1 {strides = array<i32>} : memref<6x18x3xbf16, #tpu.memory_space<vmem>>, vector<6x18x3xbf16>,
    %cst = arith.constant 0.000000e+00 : f32
    %3 = vector.broadcast %cst : f32 to vector<64x128xf32>
    %c0_7 = arith.constant 0 : index
    %c0_8 = arith.constant 0 : index
    %c0_9 = arith.constant 0 : index
    %4 = vector.load %arg8[%c0_7, %c0_8, %c0_9] : memref<6x18x3xbf16, #tpu.memory_space<vmem>>, vector<4x16x3xbf16>
    %c0_10 = arith.constant 0 : index
    %c1 = arith.constant 1 : index
    %c0_11 = arith.constant 0 : index
    %5 = vector.load %arg8[%c0_10, %c1, %c0_11] : memref<6x18x3xbf16, #tpu.memory_space<vmem>>, vector<4x16x3xbf16>
    %c0_12 = arith.constant 0 : index
    %c2 = arith.constant 2 : index
    %c0_13 = arith.constant 0 : index
    %6 = vector.load %arg8[%c0_12, %c2, %c0_13] : memref<6x18x3xbf16, #tpu.memory_space<vmem>>, vector<4x16x3xbf16>
    %7 = tpu.concatenate %4, %5, %6 in 2 : vector<4x16x3xbf16>, vector<4x16x3xbf16>, vector<4x16x3xbf16> -> vector<4x16x9xbf16>
    %8 = vector.shape_cast %7 : vector<4x16x9xbf16> to vector<64x9xbf16>
    %c0_14 = arith.constant 0 : index
    %c0_15 = arith.constant 0 : index
    %c0_16 = arith.constant 0 : index
    %9 = vector.load %arg3[%c0_14, %c0_15, %c0_16] : memref<3x9x128xbf16, #tpu.memory_space<vmem>>, vector<1x9x128xbf16>
    %10 = vector.shape_cast %9 : vector<1x9x128xbf16> to vector<9x128xbf16>
    %cst_17 = arith.constant dense<0.000000e+00> : vector<64x128xf32>
    %11 = tpu.matmul %8, %10, %cst_17 {dimension_numbers = #tpu.dot_dimension_numbers<[1], [0], [0], [1], [0, 0, 1, 1], [], []>} : vector<64x9xbf16>, vector<9x128xbf16>, vector<64x128xf32> -> vector<64x128xf32>
    %12 = arith.addf %3, %11 : vector<64x128xf32>
    %c1_18 = arith.constant 1 : index
    %c0_19 = arith.constant 0 : index
    %c0_20 = arith.constant 0 : index
    %13 = vector.load %arg8[%c1_18, %c0_19, %c0_20] : memref<6x18x3xbf16, #tpu.memory_space<vmem>>, vector<4x16x3xbf16>
    %c1_21 = arith.constant 1 : index
    %c1_22 = arith.constant 1 : index
    %c0_23 = arith.constant 0 : index
    %14 = vector.load %arg8[%c1_21, %c1_22, %c0_23] : memref<6x18x3xbf16, #tpu.memory_space<vmem>>, vector<4x16x3xbf16>
    %c1_24 = arith.constant 1 : index
    %c2_25 = arith.constant 2 : index
    %c0_26 = arith.constant 0 : index
    %15 = vector.load %arg8[%c1_24, %c2_25, %c0_26] : memref<6x18x3xbf16, #tpu.memory_space<vmem>>, vector<4x16x3xbf16>
    %16 = tpu.concatenate %13, %14, %15 in 2 : vector<4x16x3xbf16>, vector<4x16x3xbf16>, vector<4x16x3xbf16> -> vector<4x16x9xbf16>
    %17 = vector.shape_cast %16 : vector<4x16x9xbf16> to vector<64x9xbf16>
    %c1_27 = arith.constant 1 : index
    %c0_28 = arith.constant 0 : index
    %c0_29 = arith.constant 0 : index
    %18 = vector.load %arg3[%c1_27, %c0_28, %c0_29] : memref<3x9x128xbf16, #tpu.memory_space<vmem>>, vector<1x9x128xbf16>
    %19 = vector.shape_cast %18 : vector<1x9x128xbf16> to vector<9x128xbf16>
    %cst_30 = arith.constant dense<0.000000e+00> : vector<64x128xf32>
    %20 = tpu.matmul %17, %19, %cst_30 {dimension_numbers = #tpu.dot_dimension_numbers<[1], [0], [0], [1], [0, 0, 1, 1], [], []>} : vector<64x9xbf16>, vector<9x128xbf16>, vector<64x128xf32> -> vector<64x128xf32>
    %21 = arith.addf %12, %20 : vector<64x128xf32>
    %c2_31 = arith.constant 2 : index
    %c0_32 = arith.constant 0 : index
    %c0_33 = arith.constant 0 : index
    %22 = vector.load %arg8[%c2_31, %c0_32, %c0_33] : memref<6x18x3xbf16, #tpu.memory_space<vmem>>, vector<4x16x3xbf16>
    %c2_34 = arith.constant 2 : index
    %c1_35 = arith.constant 1 : index
    %c0_36 = arith.constant 0 : index
    %23 = vector.load %arg8[%c2_34, %c1_35, %c0_36] : memref<6x18x3xbf16, #tpu.memory_space<vmem>>, vector<4x16x3xbf16>
    %c2_37 = arith.constant 2 : index
    %c2_38 = arith.constant 2 : index
    %c0_39 = arith.constant 0 : index
    %24 = vector.load %arg8[%c2_37, %c2_38, %c0_39] : memref<6x18x3xbf16, #tpu.memory_space<vmem>>, vector<4x16x3xbf16>
    %25 = tpu.concatenate %22, %23, %24 in 2 : vector<4x16x3xbf16>, vector<4x16x3xbf16>, vector<4x16x3xbf16> -> vector<4x16x9xbf16>
    %26 = vector.shape_cast %25 : vector<4x16x9xbf16> to vector<64x9xbf16>
    %c2_40 = arith.constant 2 : index
    %c0_41 = arith.constant 0 : index
    %c0_42 = arith.constant 0 : index
    %27 = vector.load %arg3[%c2_40, %c0_41, %c0_42] : memref<3x9x128xbf16, #tpu.memory_space<vmem>>, vector<1x9x128xbf16>
    %28 = vector.shape_cast %27 : vector<1x9x128xbf16> to vector<9x128xbf16>
    %cst_43 = arith.constant dense<0.000000e+00> : vector<64x128xf32>
    %29 = tpu.matmul %26, %28, %cst_43 {dimension_numbers = #tpu.dot_dimension_numbers<[1], [0], [0], [1], [0, 0, 1, 1], [], []>} : vector<64x9xbf16>, vector<9x128xbf16>, vector<64x128xf32> -> vector<64x128xf32>
    %30 = arith.addf %21, %29 : vector<64x128xf32>
    %c0_44 = arith.constant 0 : index
    %c0_45 = arith.constant 0 : index
    %31 = vector.load %arg4[%c0_44, %c0_45] : memref<1x128xf32, #tpu.memory_space<vmem>>, vector<1x128xf32>
    %32 = vector.broadcast %31 : vector<1x128xf32> to vector<64x128xf32>
    %33 = arith.addf %30, %32 : vector<64x128xf32>
    %cst_46 = arith.constant 0.000000e+00 : f32
    %34 = vector.broadcast %cst_46 : f32 to vector<64x128xf32>
    %35 = arith.cmpf oge, %33, %34 : vector<64x128xf32>
    %cst_47 = arith.constant 0.00999999977 : f32
    %36 = vector.broadcast %cst_47 : f32 to vector<64x128xf32>
    %37 = arith.mulf %36, %33 : vector<64x128xf32>
    %38 = arith.select %35, %33, %37 : vector<64x128xi1>, vector<64x128xf32>
    %39 = vector.shape_cast %38 : vector<64x128xf32> to vector<1x4x16x128xf32>
    %40 = arith.truncf %39 : vector<1x4x16x128xf32> to vector<1x4x16x128xbf16>
    %c0_48 = arith.constant 0 : index
    %c0_49 = arith.constant 0 : index
    %c0_50 = arith.constant 0 : index
    %c0_51 = arith.constant 0 : index
    %41 = vector.load %arg5[%c0_48, %c0_49, %c0_50, %c0_51] : memref<1x4x16x128xbf16, #tpu.memory_space<vmem>>, vector<1x4x16x128xbf16>
    tpu.vector_store %arg5[%c0_48, %c0_49, %c0_50, %c0_51], %40 {strides = array<i32>} : memref<1x4x16x128xbf16, #tpu.memory_space<vmem>>, vector<1x4x16x128xbf16>,
    %cst_52 = arith.constant dense<0.000000e+00> : vector<128xf32>
    %42 = vector.multi_reduction <add>, %38, %cst_52 [0] : vector<64x128xf32> to vector<128xf32>
    %43 = vector.shape_cast %42 : vector<128xf32> to vector<1x1x128xf32>
    %44 = arith.mulf %38, %38 : vector<64x128xf32>
    %cst_53 = arith.constant dense<0.000000e+00> : vector<128xf32>
    %45 = vector.multi_reduction <add>, %44, %cst_53 [0] : vector<64x128xf32> to vector<128xf32>
    %46 = vector.shape_cast %45 : vector<128xf32> to vector<1x1x128xf32>
    %c0_i32 = arith.constant 0 : i32
    %47 = arith.cmpi eq, %arg1, %c0_i32 : i32
    %48 = arith.extui %47 : i1 to i32
    %c0_i32_54 = arith.constant 0 : i32
    %49 = arith.cmpi ne, %48, %c0_i32_54 : i32
    scf.if %49 {
      %c0_57 = arith.constant 0 : index
      %c0_58 = arith.constant 0 : index
      %c0_59 = arith.constant 0 : index
      %53 = vector.load %arg6[%c0_57, %c0_58, %c0_59] : memref<1x1x128xf32, #tpu.memory_space<vmem>>, vector<1x1x128xf32>
      tpu.vector_store %arg6[%c0_57, %c0_58, %c0_59], %43 {strides = array<i32>} : memref<1x1x128xf32, #tpu.memory_space<vmem>>, vector<1x1x128xf32>,
      %c0_60 = arith.constant 0 : index
      %c0_61 = arith.constant 0 : index
      %c0_62 = arith.constant 0 : index
      %54 = vector.load %arg7[%c0_60, %c0_61, %c0_62] : memref<1x1x128xf32, #tpu.memory_space<vmem>>, vector<1x1x128xf32>
      tpu.vector_store %arg7[%c0_60, %c0_61, %c0_62], %46 {strides = array<i32>} : memref<1x1x128xf32, #tpu.memory_space<vmem>>, vector<1x1x128xf32>,
    } else {
    }
    %c0_i32_55 = arith.constant 0 : i32
    %50 = arith.cmpi sgt, %arg1, %c0_i32_55 : i32
    %51 = arith.extui %50 : i1 to i32
    %c0_i32_56 = arith.constant 0 : i32
    %52 = arith.cmpi ne, %51, %c0_i32_56 : i32
    scf.if %52 {
      %c0_57 = arith.constant 0 : index
      %c0_58 = arith.constant 0 : index
      %c0_59 = arith.constant 0 : index
      %53 = vector.load %arg6[%c0_57, %c0_58, %c0_59] : memref<1x1x128xf32, #tpu.memory_space<vmem>>, vector<1x1x128xf32>
      %54 = arith.addf %53, %43 : vector<1x1x128xf32>
      %c0_60 = arith.constant 0 : index
      %c0_61 = arith.constant 0 : index
      %c0_62 = arith.constant 0 : index
      %55 = vector.load %arg6[%c0_60, %c0_61, %c0_62] : memref<1x1x128xf32, #tpu.memory_space<vmem>>, vector<1x1x128xf32>
      tpu.vector_store %arg6[%c0_60, %c0_61, %c0_62], %54 {strides = array<i32>} : memref<1x1x128xf32, #tpu.memory_space<vmem>>, vector<1x1x128xf32>,
      %c0_63 = arith.constant 0 : index
      %c0_64 = arith.constant 0 : index
      %c0_65 = arith.constant 0 : index
      %56 = vector.load %arg7[%c0_63, %c0_64, %c0_65] : memref<1x1x128xf32, #tpu.memory_space<vmem>>, vector<1x1x128xf32>
      %57 = arith.addf %56, %46 : vector<1x1x128xf32>
      %c0_66 = arith.constant 0 : index
      %c0_67 = arith.constant 0 : index
      %c0_68 = arith.constant 0 : index
      %58 = vector.load %arg7[%c0_66, %c0_67, %c0_68] : memref<1x1x128xf32, #tpu.memory_space<vmem>>, vector<1x1x128xf32>
      tpu.vector_store %arg7[%c0_66, %c0_67, %c0_68], %57 {strides = array<i32>} : memref<1x1x128xf32, #tpu.memory_space<vmem>>, vector<1x1x128xf32>,
    } else {
    }
    return
  }
  func.func @transform_0(%arg0: i32, %arg1: i32) -> (i32, i32, i32, i32, i32) {
    %c0_i32 = arith.constant 0 : i32
    %c0_i32_0 = arith.constant 0 : i32
    %c0_i32_1 = arith.constant 0 : i32
    %c0_i32_2 = arith.constant 0 : i32
    return %arg0, %arg1, %c0_i32, %c0_i32_0, %c0_i32_1 : i32, i32, i32, i32, i32
  }
  func.func @transform_1(%arg0: i32, %arg1: i32) -> (i32, i32, i32) {
    %c0_i32 = arith.constant 0 : i32
    %c0_i32_0 = arith.constant 0 : i32
    %c0_i32_1 = arith.constant 0 : i32
    %c0_i32_2 = arith.constant 0 : i32
    return %c0_i32, %c0_i32_0, %c0_i32_1 : i32, i32, i32
  }
  func.func @transform_2(%arg0: i32, %arg1: i32) -> (i32, i32) {
    %c0_i32 = arith.constant 0 : i32
    %c0_i32_0 = arith.constant 0 : i32
    %c0_i32_1 = arith.constant 0 : i32
    return %c0_i32, %c0_i32_0 : i32, i32
  }
  func.func @transform_3(%arg0: i32, %arg1: i32) -> (i32, i32, i32, i32) {
    %c0_i32 = arith.constant 0 : i32
    %c0_i32_0 = arith.constant 0 : i32
    %c0_i32_1 = arith.constant 0 : i32
    return %arg0, %arg1, %c0_i32, %c0_i32_0 : i32, i32, i32, i32
  }
  func.func @transform_4(%arg0: i32, %arg1: i32) -> (i32, i32, i32) {
    %c0_i32 = arith.constant 0 : i32
    %c0_i32_0 = arith.constant 0 : i32
    %c0_i32_1 = arith.constant 0 : i32
    return %arg0, %c0_i32, %c0_i32_0 : i32, i32, i32
  }
  func.func @transform_5(%arg0: i32, %arg1: i32) -> (i32, i32, i32) {
    %c0_i32 = arith.constant 0 : i32
    %c0_i32_0 = arith.constant 0 : i32
    %c0_i32_1 = arith.constant 0 : i32
    return %arg0, %c0_i32, %c0_i32_0 : i32, i32, i32
  }
}

</mosaic_0001>

<bundles_post_ra>
// kernel: _t1.1
= control target key start
LH: loop header
LB: loop body
LE: loop exit
PB: predicated region body
PF: predicated region fallthrough
CT: control target
= control target key end

     0   :  { %11 = vsyncpa [#allocation4], 0  ;;  %s2129_s0 = inlined_call_operand.vmem [shape: bf16[2,4,6,18,3], index: 0, kind: input, shape index: {}]   ;;  %s2130_s1 = inlined_call_operand.vmem [shape: bf16[3,9,128], index: 1, kind: input, shape index: {}]   ;;  %s2131_s2 = inlined_call_operand.vmem [shape: f32[1,128], index: 2, kind: input, shape index: {}]   ;;  %s2132_s3 = inlined_call_operand.hbm [shape: bf16[2,16,16,128], index: 3, kind: output, shape index: {0}]   ;;  %s2133_s4 = inlined_call_operand.vmem [shape: f32[2,1,128], index: 4, kind: output, shape index: {1}]   ;;  %s2134_s5 = inlined_call_operand.vmem [shape: f32[2,1,128], index: 5, kind: output, shape index: {2}]  }
   0x1   :  { %13 = vsyncpa [#allocation4 + $0x1], 0  ;;  %s1721_s18 = smov 0   ;;  %s1723_s19 = smov 0  }
   0x2   :  { %s1725_s20 = smov 0   ;;  %s1727_s21 = smov 0  }
   0x3   :  { %s1729_s22 = smov 0   ;;  %s1731_s23 = smov 0  }
   0x4   :  { %s1733_s24 = smov 0   ;;  %s1735_s25 = smov 0  }
   0x5 LB: > { %2138 = sst [smem:[#allocation6_spill]] %s1679_s24  ;;  %s1315_s26 = sadd.s32 4294967295, %s1683_s25   ;;  %s1683_s25 = sphi %s1735_s25, %s19_s25   ;;  %s1679_s24 = sphi %s1733_s24, %s2145_s24   ;;  %s1675_s23 = sphi %s1731_s23, %s2150_s23   ;;  %s1671_s22 = sphi %s1729_s22, %s2143_s22   ;;  %s1667_s21 = sphi %s1727_s21, %s2149_s21   ;;  %s1663_s20 = sphi %s1725_s20, %s2148_s20   ;;  %s1659_s19 = sphi %s1723_s19, %s2147_s19   ;;  %s1655_s18 = sphi %s1721_s18, %s2146_s18  }
   0x6   : > { %s1316_s27 = sadd.s32 4294967294, %s1683_s25   ;;  %s28_s28 = sadd.s32 1, %s1675_s23 }
   0x7   : > { %p29_p0 = scmp.ge.s32.totalorder %s28_s28, 4  ;;  %s31_s29 = sadd.s32 1, %s1679_s24 }
   0x8   : > { %p120_p1 = scmp.ne.s32.totalorder %s1663_s20, %s1659_s19  ;;  %p121_p2 = scmp.eq.s32.totalorder %s1315_s26, 7 }
   0x9   : > { %s2152_s28 = smov (%p29_p0, %s28_s28), 0  ;;  %s2154_s29 = smov (!%p29_p0, %s31_s29), %s1679_s24 }
   0xa   : > { %2139 = sst [smem:[#allocation7_spill]] %s2152_s28  ;;  %s106_s30 = ssub.s32 %s1675_s23, %s2152_s28 }
   0xb   : > { %p1772_p3 = por %p121_p2, %p120_p1  ;;  %p33_p4 = scmp.ge.s32.totalorder %s2154_s29, 2 }
   0xc   : > { %p126_p5 = scmp.ne.s32.totalorder %s1659_s19, %s1655_s18  ;;  %p127_p6 = scmp.eq.s32.totalorder %s1316_s27, 7 }
   0xd   : > { %p1319_p7 = scmp.ge.s32.totalorder %s1683_s25, 1  ;;  %s2156_s29 = smov (%p33_p4, %s2154_s29), 0 }
   0xe   : > { %2141 = sst [smem:[#allocation8_spill]] %s2156_s29  ;;  %p1781_p8 = por %p127_p6, %p126_p5 }
   0xf   : > { %p215_p9 = scmp.lt.s32.totalorder %s1683_s25, 9  ;;  %s105_s8 = ssub.s32 %s1679_s24, %s2156_s29 }
  0x10   : > { %s110_s9 = sadd.s32 1, %s1663_s20  ;;  %s107_s10 = sor.u32 %s106_s30, %s105_s8 }
  0x11   : > { %p216_p10 = pnand %p1319_p7, %p215_p9  ;;  %p108_p11 = scmp.eq.s32.totalorder %s107_s10, 0 }
  0x12   : > { %p253_p12 = scmp.lt.s32.totalorder (!%p216_p10), %s1671_s22, 1  ;;  %p255_p13 = scmp.lt.s32.totalorder (!%p216_p10), %s1667_s21, 3 }
  0x13   : > { %s1790_s11 = scalar_select %p108_p11, %s1663_s20, %s110_s9  }
  0x14   : > { %219 = sbr.rel (%p216_p10) target bundleno = 479 (0x1df), region = 32  ;;  %s1686_s28 = smov (!%p216_p10), 3  }
  0x15   : > { %s240_s30 = sand.u32 (!%p216_p10), 1, %s1659_s19   ;;  %p1386_p0 = scmp.ne.s32.totalorder (!%p216_p10), %s1667_s21, 0 }
  0x19   : > { %s254_s12 = scalar_select %p253_p12, %s1671_s22, 1  ;;  %vm288_vm0 = vcmask 19456   ;;  %vm291_vm1 = vcmask 16384   ;;  %vm425_vm2 = vcmask 1046528   ;;  %vm356_vm3 = vsmask.f32 7424 }
  0x1a   : > { %s256_s13 = scalar_select %p255_p13, %s1667_s21, 3  ;;  %vm636_vm4 = vcmask 1043456   ;;  %vm637_vm5 = vcmask 1044480   ;;  %vm446_vm6 = vcmask 23552   ;;  %vm455_vm7 = vcmask 48128  }
  0x1b   : > { %s1475_s14 = smul.u32 72, %s254_s12  ;;  %s1799_s17 = scalar_lea.vmem %s2133_s4, %s254_s12  ;;  %vm627_vm8 = vcmask 72704  }
  0x1c   : > { %s1474_s26 = smul.u32 18, %s256_s13  ;;  %s1804_s8 = scalar_lea.vmem %s2134_s5, %s254_s12 }
  0x1e   : > { %s259_s9 = sadd.s32 %s1475_s14, %s1474_s26 }
  0x1f   : > { %s1321_s10 = sshll.u32 %s259_s9, 2  ;;  %s1320_s9 = sshll.u32 %s240_s30, 5 }
  0x20   : > { %s1809_s24 = scalar_lea.vmem %s2129_s0, %s1321_s10  ;;  %s2048_s10 = scalar_lea.vmem [#allocation3], %s1320_s9 }
  0x21   : > { %v282_v0 = vld [vmem:[%s1809_s24 + $0x30] sm:$0xf]  ;;  %v283_v1 = vld [vmem:[%s1809_s24 + $0x34] sm:$0xf]  ;;  %v284_v2 = vld [vmem:[%s1809_s24 + $0x38] sm:$0x1] }
  0x22   : > { %302 = vst.msk [vmem:[#allocation2 + $0x30] sm:$0xf] %vm288_vm0, %v282_v0  ;;  %303 = vst.msk [vmem:[#allocation2 + $0x34] sm:$0xf] %vm288_vm0, %v283_v1  ;;  %v279_v3 = vld [vmem:[%s1809_s24 + $0x24] sm:$0xf] }
  0x23   : > { %304 = vst.msk [vmem:[#allocation2 + $0x38] sm:$0x1] %vm291_vm1, %v284_v2  ;;  %v280_v4 = vld [vmem:[%s1809_s24 + $0x28] sm:$0xf]  ;;  %v281_v5 = vld [vmem:[%s1809_s24 + $0x2c] sm:$0x1] }
  0x24   : > { %299 = vst.msk [vmem:[#allocation2 + $0x24] sm:$0xf] %vm288_vm0, %v279_v3  ;;  %300 = vst.msk [vmem:[#allocation2 + $0x28] sm:$0xf] %vm288_vm0, %v280_v4  ;;  %v276_v6 = vld [vmem:[%s1809_s24 + $0x18] sm:$0xf] }
  0x25   : > { %301 = vst.msk [vmem:[#allocation2 + $0x2c] sm:$0x1] %vm291_vm1, %v281_v5  ;;  %v277_v7 = vld [vmem:[%s1809_s24 + $0x1c] sm:$0xf]  ;;  %v278_v8 = vld [vmem:[%s1809_s24 + $0x20] sm:$0x1] }
  0x26   : > { %296 = vst.msk [vmem:[#allocation2 + $0x18] sm:$0xf] %vm288_vm0, %v276_v6  ;;  %297 = vst.msk [vmem:[#allocation2 + $0x1c] sm:$0xf] %vm288_vm0, %v277_v7  ;;  %v273_v9 = vld [vmem:[%s1809_s24 + $0xc] sm:$0xf] }
  0x27   : > { %298 = vst.msk [vmem:[#allocation2 + $0x20] sm:$0x1] %vm291_vm1, %v278_v8  ;;  %v274_v10 = vld [vmem:[%s1809_s24 + $0x10] sm:$0xf]  ;;  %v275_v11 = vld [vmem:[%s1809_s24 + $0x14] sm:$0x1] }
  0x28   : > { %293 = vst.msk [vmem:[#allocation2 + $0xc] sm:$0xf] %vm288_vm0, %v273_v9  ;;  %294 = vst.msk [vmem:[#allocation2 + $0x10] sm:$0xf] %vm288_vm0, %v274_v10  ;;  %v270_v12 = vld [vmem:[%s1809_s24] sm:$0xf] }
  0x29   : > { %295 = vst.msk [vmem:[#allocation2 + $0x14] sm:$0x1] %vm291_vm1, %v275_v11  ;;  %v271_v13 = vld [vmem:[%s1809_s24 + $0x4] sm:$0xf]  ;;  %v272_v14 = vld [vmem:[%s1809_s24 + $0x8] sm:$0x1] }
  0x2a   : > { %289 = vst.msk [vmem:[#allocation2] sm:$0xf] %vm288_vm0, %v270_v12  ;;  %290 = vst.msk [vmem:[#allocation2 + $0x4] sm:$0xf] %vm288_vm0, %v271_v13  ;;  %v285_v15 = vld [vmem:[%s1809_s24 + $0x3c] sm:$0xf] }
  0x2b   : > { %292 = vst.msk [vmem:[#allocation2 + $0x8] sm:$0x1] %vm291_vm1, %v272_v14  ;;  %v286_v16 = vld [vmem:[%s1809_s24 + $0x40] sm:$0xf]  ;;  %v287_v17 = vld [vmem:[%s1809_s24 + $0x44] sm:$0x1] }
  0x2c   : > { %305 = vst.msk [vmem:[#allocation2 + $0x3c] sm:$0xf] %vm288_vm0, %v285_v15  ;;  %306 = vst.msk [vmem:[#allocation2 + $0x40] sm:$0xf] %vm288_vm0, %v286_v16  ;;  %v474_v18 = vld [vmem:[#allocation2 + $0x34] sm:$0xf] }
  0x2d   : > { %307 = vst.msk [vmem:[#allocation2 + $0x44] sm:$0x1] %vm291_vm1, %v287_v17  ;;  %v482_v19 = vld [vmem:[#allocation2 + $0x30] sm:$0xe]  ;;  %v472_v22 = vld [vmem:[#allocation2 + $0x28] sm:$0xf] }
  0x2e   : > { %v1847_v20 = vld [vmem:[#allocation2 + $0x38] ss:$0 sps:$4 sm:$0x11]   ;;  %v1345_v21 = vcombine.low %v482_v19, %v474_v18  ;;  %v481_v23 = vld [vmem:[#allocation2 + $0x24] sm:$0xe]  ;;  %s1685_s24 = smov 6  }
  0x2f   : > { %v593_v25 = vrot.slane %v1847_v20, 1  ;;  %v1555_v26 = vld [vmem:[#allocation2 + $0x2c] ss:$0 sps:$4 sm:$0x11]   ;;  %v1344_v27 = vcombine.low %v481_v23, %v472_v22  ;;  %v470_v28 = vld [vmem:[#allocation2 + $0x1c] sm:$0xf] }
  0x30   : > { %v592_v24 = vrot.slane %v1345_v21, 1  ;;  %v590_v31 = vrot.slane %v1555_v26, 1  ;;  %v471_v32 = vld [vmem:[#allocation2 + $0x24] sm:$0xf]  ;;  %v480_v33 = vld [vmem:[#allocation2 + $0x18] sm:$0xe] }
  0x31   : > { %v589_v30 = vrot.slane %v1344_v27, 1  ;;  %v473_v34 = vld [vmem:[#allocation2 + $0x30] sm:$0xf]  ;;  %v1852_v35 = vld [vmem:[#allocation2 + $0x20] ss:$0 sps:$4 sm:$0x11]   ;;  %v1343_v36 = vcombine.low %v480_v33, %v470_v28  ;;  %v1858_v48 = vcombine.low %v471_v32, %v472_v22 }
  0x32   : > { %v594_v29 = vsel %vm425_vm2, %v592_v24, %v593_v25  ;;  %v469_v37 = vld [vmem:[#allocation2 + $0x18] sm:$0xf]  ;;  %v468_v38 = vld [vmem:[#allocation2 + $0x10] sm:$0xf]  ;;  %v559_v39 = vshll.u32 %v1847_v20, 16  ;;  %v587_v44 = vrot.slane %v1852_v35, 1  ;;  %v1865_v57 = vcombine.low %v473_v34, %v474_v18 }
  0x33   : > { %601 = vrot.lane.b32.xlu0 %v594_v29, %s1685_s24  ;;  %v591_v40 = vsel %vm425_vm2, %v589_v30, %v590_v31  ;;  %v479_v41 = vld [vmem:[#allocation2 + $0xc] sm:$0xe]  ;;  %v586_v43 = vrot.slane %v1343_v36, 1  ;;  %v1561_v45 = vld [vmem:[#allocation2 + $0x14] ss:$0 sps:$4 sm:$0x11]   ;;  %v1867_v58 = vcombine.low %v469_v37, %v470_v28 }
  0x34   : > { %v467_v42 = vld [vmem:[#allocation2 + $0xc] sm:$0xf]  ;;  %599 = vrot.lane.b32.xlu1 %v591_v40, %s1685_s24  ;;  %v1342_v46 = vcombine.low %v479_v41, %v468_v38  ;;  %v547_v47 = vshll.u32 %v1555_v26, 16  ;;  %v311_v50 = vld [vmem:[#allocation2 + $0x10] sm:$0xf]  ;;  %v584_v54 = vrot.slane %v1561_v45, 1 }
  0x35   : > { %v1860_v49 = vcombine.low %v467_v42, %v468_v38  ;;  %v321_v51 = vld [vmem:[#allocation2 + $0xc] sm:$0xe]  ;;  %v588_v52 = vsel %vm425_vm2, %v586_v43, %v587_v44  ;;  %v1863_v55 = vld [vmem:[#allocation2 + $0x14] ss:$0 sps:$4 sm:$0x11]   ;;  %v523_v9 = vshll.u32 %v1561_v45, 16 }
  0x36   : > { %v583_v53 = vrot.slane %v1342_v46, 1  ;;  %v1331_v56 = vcombine.low %v321_v51, %v311_v50  ;;  %v310_v59 = vld [vmem:[#allocation2 + $0xc] sm:$0xf]  ;;  %v309_v60 = vld [vmem:[#allocation2 + $0x4] sm:$0xf]  ;;  %v430_v63 = vrot.slane %v1863_v55, 1 }
  0x37   : > { %v1872_v0 = vcombine.low %v310_v59, %v311_v50  ;;  %v320_v1 = vld [vmem:[#allocation2] sm:$0xe]  ;;  %v1567_v3 = vld [vmem:[#allocation2 + $0x8] ss:$0 sps:$4 sm:$0x11]   ;;  %v516_v6 = vshrl.u32 %v1860_v49, 16 }
  0x38   : > { %597 = vrot.lane.b32.xlu1 %v588_v52, %s1685_s24  ;;  %v585_v61 = vsel %vm425_vm2, %v583_v53, %v584_v54  ;;  %v429_v62 = vrot.slane %v1331_v56, 1  ;;  %v308_v2 = vld [vmem:[#allocation2] sm:$0xf]  ;;  %v1330_v4 = vcombine.low %v320_v1, %v309_v60  ;;  %v518_v7 = vshll.u32 %v1860_v49, 16  ;;  %v792_v24 = vld [vmem:[#allocation2 + $0x24] sm:$0xf] }
  0x39   : > { %595 = vrot.lane.b32.xlu0 %v585_v61, %s1685_s24  ;;  %v1875_v5 = vcombine.low %v308_v2, %v309_v60  ;;  %v540_v10 = vshrl.u32 %v1858_v48, 16  ;;  %v542_v11 = vshll.u32 %v1858_v48, 16  ;;  %v427_v13 = vrot.slane %v1567_v3, 1  ;;  %v793_v29 = vld [vmem:[#allocation2 + $0x28] sm:$0xf] }
  0x3a   : > { %v431_v8 = vsel %vm425_vm2, %v429_v62, %v430_v63  ;;  %v426_v12 = vrot.slane %v1330_v4, 1  ;;  %v520_v14 = vrot.slane %v518_v7, 1  ;;  %v549_v15 = vrot.slane %v547_v47, 1  ;;  %v1893_v34 = vld [vmem:[#allocation2 + $0x2c] ss:$0 sps:$4 sm:$0x11]  }
  0x3b   : > { %v525_v16 = vrot.slane %v523_v9, 1  ;;  %v544_v17 = vrot.slane %v542_v11, 1  ;;  %v528_v18 = vshrl.u32 %v1867_v58, 16  ;;  %v530_v19 = vshll.u32 %v1867_v58, 16  ;;  %v791_v44 = vld [vmem:[#allocation2 + $0x1c] sm:$0xf] }
  0x3c   : > { %440 = vrot.lane.b32.xlu1 %v431_v8, %s1685_s24  ;;  %v428_v20 = vsel %vm425_vm2, %v426_v12, %v427_v13  ;;  %v521_v21 = vor.u32 %v520_v14, %v516_v6  ;;  %v535_v22 = vshll.u32 %v1852_v35, 16  ;;  %v552_v23 = vshrl.u32 %v1865_v57, 16  ;;  %v1904_v51 = vld [vmem:[#allocation2 + $0x20] ss:$0 sps:$4 sm:$0x11]  }
  0x3d   : > { %438 = vrot.lane.b32.xlu0 %v428_v20, %s1685_s24  ;;  %v545_v25 = vor.u32 %v544_v17, %v540_v10  ;;  %v532_v26 = vrot.slane %v530_v19, 1  ;;  %v554_v27 = vshll.u32 %v1865_v57, 16  ;;  %v561_v28 = vrot.slane %v559_v39, 1  ;;  %v790_v39 = vld [vmem:[#allocation2 + $0x18] sm:$0xf] }
  0x3e   : > { %v526_v30 = vsel %vm356_vm3, %v521_v21, %v525_v16  ;;  %v537_v31 = vrot.slane %v535_v22, 1  ;;  %v370_v32 = vshrl.u32 %v1872_v0, 16  ;;  %v372_v33 = vshll.u32 %v1872_v0, 16  ;;  %v803_v52 = vld [vmem:[#allocation2 + $0x24] sm:$0xe] }
  0x3f   : > { %v550_v35 = vsel %vm356_vm3, %v545_v25, %v549_v15  ;;  %v533_v36 = vor.u32 %v532_v26, %v528_v18  ;;  %v556_v37 = vrot.slane %v554_v27, 1  ;;  %v377_v38 = vshll.u32 %v1863_v55, 16  ;;  %v802_v59 = vld [vmem:[#allocation2 + $0x18] sm:$0xe]  ;;  %v314_v1 = vld [vmem:[#allocation2 + $0x24] sm:$0xf] }
  0x40   : > { %563 = vrot.lane.b32.xlu1 %v526_v30, %s1686_s28  ;;  %v374_v40 = vrot.slane %v372_v33, 1  ;;  %v358_v41 = vshrl.u32 %v1875_v5, 16  ;;  %v360_v42 = vshll.u32 %v1875_v5, 16  ;;  %v365_v43 = vshll.u32 %v1567_v3, 16  ;;  %v315_v2 = vld [vmem:[#allocation2 + $0x28] sm:$0xf] }
  0x41   : > { %567 = vrot.lane.b32.xlu0 %v550_v35, %s1686_s28  ;;  %v538_v45 = vsel %vm356_vm3, %v533_v36, %v537_v31  ;;  %v557_v46 = vor.u32 %v556_v37, %v552_v23  ;;  %v379_v47 = vrot.slane %v377_v38, 1  ;;  %v1902_v50 = vcombine.low %v792_v24, %v793_v29  ;;  %v312_v3 = vld [vmem:[#allocation2 + $0x18] sm:$0xf]  ;;  %v1915_v9 = vld [vmem:[#allocation2 + $0x2c] ss:$0 sps:$4 sm:$0x11]  }
  0x42   : > { %v375_v53 = vor.u32 %v374_v40, %v370_v32  ;;  %v362_v54 = vrot.slane %v360_v42, 1  ;;  %v367_v55 = vrot.slane %v365_v43, 1  ;;  %v858_v56 = vshll.u32 %v1893_v34, 16  ;;  %v313_v14 = vld [vmem:[#allocation2 + $0x1c] sm:$0xf] }
  0x43   : > { %v562_v60 = vsel %vm356_vm3, %v557_v46, %v561_v28  ;;  %v851_v61 = vshrl.u32 %v1902_v50, 16  ;;  %v853_v62 = vshll.u32 %v1902_v50, 16  ;;  %v1911_v63 = vcombine.low %v790_v39, %v791_v44  ;;  %v1924_v23 = vld [vmem:[#allocation2 + $0x20] ss:$0 sps:$4 sm:$0x11]  }
  0x44   : > { %565 = vrot.lane.b32.xlu1 %v538_v45, %s1686_s28  ;;  %v380_v4 = vsel %vm356_vm3, %v375_v53, %v379_v47  ;;  %v363_v6 = vor.u32 %v362_v54, %v358_v41  ;;  %v860_v7 = vrot.slane %v858_v56, 1  ;;  %v846_v8 = vshll.u32 %v1904_v51, 16  ;;  %v323_v28 = vld [vmem:[#allocation2 + $0x24] sm:$0xe]  ;;  %v796_v32 = vld [vmem:[#allocation2 + $0x3c] sm:$0xf] }
  0x45   : > { %569 = vrot.lane.b32.xlu0 %v562_v60, %s1686_s28  ;;  %v855_v10 = vrot.slane %v853_v62, 1  ;;  %v839_v11 = vshrl.u32 %v1911_v63, 16  ;;  %v841_v12 = vshll.u32 %v1911_v63, 16  ;;  %v1367_v13 = vcombine.low %v803_v52, %v793_v29  ;;  %v322_v29 = vld [vmem:[#allocation2 + $0x18] sm:$0xe] }
  0x46   : > { %v368_v15 = vsel %vm356_vm3, %v363_v6, %v367_v55  ;;  %v848_v16 = vrot.slane %v846_v8, 1  ;;  %v910_v17 = vrot.slane %v1893_v34, 1  ;;  %v1366_v18 = vcombine.low %v802_v59, %v791_v44  ;;  %v1933_v33 = vld [vmem:[#allocation2 + $0x40] sm:$0xf]  ;;  %v794_v41 = vld [vmem:[#allocation2 + $0x30] sm:$0xf] }
  0x47   : > { %v856_v19 = vor.u32 %v855_v10, %v851_v61  ;;  %v843_v20 = vrot.slane %v841_v12, 1  ;;  %v909_v21 = vrot.slane %v1367_v13, 1  ;;  %v907_v22 = vrot.slane %v1904_v51, 1  ;;  %v1938_v37 = vld [vmem:[#allocation2 + $0x44] ss:$0 sps:$4 sm:$0x11]  }
  0x48   : > { %407 = vrot.lane.b32.xlu1 %v380_v4, %s1686_s28  ;;  %v906_v24 = vrot.slane %v1366_v18, 1  ;;  %v1926_v25 = vcombine.low %v314_v1, %v315_v2  ;;  %v401_v26 = vshll.u32 %v1915_v9, 16  ;;  %v1929_v27 = vcombine.low %v312_v3, %v313_v14  ;;  %v795_v46 = vld [vmem:[#allocation2 + $0x34] sm:$0xf]  ;;  %v805_v10 = vld [vmem:[#allocation2 + $0x3c] sm:$0xe] }
  0x49   : > { %405 = vrot.lane.b32.xlu0 %v368_v15, %s1686_s28  ;;  %v861_v30 = vsel %vm356_vm3, %v856_v19, %v860_v7  ;;  %v844_v31 = vor.u32 %v843_v20, %v839_v11  ;;  %v389_v36 = vshll.u32 %v1924_v23, 16  ;;  %v911_v42 = vsel %vm425_vm2, %v909_v21, %v910_v17  ;;  %v1585_v60 = vld [vmem:[#allocation2 + $0x38] ss:$0 sps:$4 sm:$0x11]   ;;  %v804_v17 = vld [vmem:[#allocation2 + $0x30] sm:$0xe] }
  0x4a   : > { %v394_v34 = vshrl.u32 %v1926_v25, 16  ;;  %v396_v35 = vshll.u32 %v1926_v25, 16  ;;  %v382_v39 = vshrl.u32 %v1929_v27, 16  ;;  %v384_v40 = vshll.u32 %v1929_v27, 16  ;;  %v1588_v20 = vld [vmem:[%s2130_s1 + $0x8] sm:$0x1f]  }
  0x4b   : > { %v849_v38 = vsel %vm356_vm3, %v844_v31, %v848_v16  ;;  %v403_v44 = vrot.slane %v401_v26, 1  ;;  %v1333_v45 = vcombine.low %v323_v28, %v315_v2  ;;  %v908_v47 = vsel %vm425_vm2, %v906_v24, %v907_v22  ;;  %v1590_v21 = vld [vmem:[%s2130_s1 + $0x10] sm:$0x1f]  }
  0x4c   : > { %888 = vrot.lane.b32.xlu1 %v861_v30, %s1686_s28  ;;  %v398_v43 = vrot.slane %v396_v35, 1  ;;  %v386_v51 = vrot.slane %v384_v40, 1  ;;  %v1332_v52 = vcombine.low %v322_v29, %v313_v14  ;;  %v1948_v53 = vcombine.low %v796_v32, %v1933_v33 }
  0x4d   : > { %886 = vrot.lane.b32.xlu0 %v849_v38, %s1686_s28  ;;  %v391_v55 = vrot.slane %v389_v36, 1  ;;  %v436_v56 = vrot.slane %v1915_v9, 1  ;;  %v1951_v59 = vcombine.low %v794_v41, %v795_v46  ;;  %v435_v62 = vrot.slane %v1333_v45, 1 }
  0x4e   : > { %v399_v54 = vor.u32 %v398_v43, %v394_v34  ;;  %v387_v61 = vor.u32 %v386_v51, %v382_v39  ;;  %v877_v1 = vshll.u32 %v1948_v53, 16  ;;  %v882_v2 = vshll.u32 %v1938_v37, 16 }
  0x4f   : > { %v875_v4 = vshrl.u32 %v1948_v53, 16  ;;  %v432_v6 = vrot.slane %v1332_v52, 1  ;;  %v433_v7 = vrot.slane %v1924_v23, 1  ;;  %v865_v9 = vshll.u32 %v1951_v59, 16  ;;  %v1589_v23 = vld [vmem:[%s2130_s1] sm:$0x1f]  }
  0x50   : > { %920 = vrot.lane.b32.xlu1 %v911_v42, %s1685_s24  ;;  %v404_v3 = vsel %vm356_vm3, %v399_v54, %v403_v44  ;;  %v879_v8 = vrot.slane %v877_v1, 1  ;;  %v392_v11 = vsel %vm356_vm3, %v387_v61, %v391_v55  ;;  %v863_v12 = vshrl.u32 %v1951_v59, 16 }
  0x51   : > { %918 = vrot.lane.b32.xlu0 %v908_v47, %s1685_s24  ;;  %v870_v13 = vshll.u32 %v1585_v60, 16  ;;  %v437_v14 = vsel %vm425_vm2, %v435_v62, %v436_v56  ;;  %v884_v15 = vrot.slane %v882_v2, 1  ;;  %v867_v16 = vrot.slane %v865_v9, 1 }
  0x52   : > { %v880_v18 = vor.u32 %v879_v8, %v875_v4  ;;  %v1369_v19 = vcombine.low %v805_v10, %v1933_v33  ;;  %v434_v22 = vsel %vm425_vm2, %v432_v6, %v433_v7  ;;  %v1368_v28 = vcombine.low %v804_v17, %v795_v46 }
  0x53   : > { %v868_v24 = vor.u32 %v867_v16, %v863_v12  ;;  %v872_v26 = vrot.slane %v870_v13, 1  ;;  %v1687_v29 = vmov 65535   ;;  %v916_v31 = vrot.slane %v1938_v37, 1 }
  0x54   : > { %411 = vrot.lane.b32.xlu1 %v404_v3, %s1686_s28  ;;  %v638_v30 = vsel %vm636_vm4, 4294967295, %v1687_v29  ;;  %v885_v33 = vsel %vm356_vm3, %v880_v18, %v884_v15  ;;  %v915_v34 = vrot.slane %v1369_v19, 1  ;;  %v912_v40 = vrot.slane %v1368_v28, 1 }
  0x55   : > { %409 = vrot.lane.b32.xlu0 %v392_v11, %s1686_s28  ;;  %v639_v32 = vsel %vm637_vm5, %v638_v30, 0  ;;  %v873_v39 = vsel %vm356_vm3, %v868_v24, %v872_v26  ;;  %v913_v41 = vrot.slane %v1585_v60, 1 }
  0x56   : > { %v641_v35 = vand.u32 %v1588_v20, %v639_v32  ;;  %v959_v36 = vand.u32 %v1590_v21, %v639_v32  ;;  %v722_v38 = vand.u32 %v1589_v23, %v639_v32  ;;  %v917_v37 = vsel %vm425_vm2, %v915_v34, %v916_v31 }
  0x57   : > { %v914_v42 = vsel %vm425_vm2, %v912_v40, %v913_v41  ;;  %v2039_v41 = vld [vmem:[%s2131_s2] ss:$0 sm:$0xff] }
  0x58   : > { %444 = vrot.lane.b32.xlu1 %v437_v14, %s1685_s24  ;;  %1442 = vmatprep.subr.bf16.mxu0 %v641_v35 }
  0x59   : > { %442 = vrot.lane.b32.xlu0 %v434_v22, %s1685_s24  ;;  %1472 = vmatprep.subr.bf16.mxu1 %v641_v35 }
  0x5a   : > { %1443 = vmatpush3.bf16.msra.mxu0 %v641_v35  ;;  %1473 = vmatpush3.bf16.msra.mxu1 %v641_v35 }
  0x5b   : > { %1462 = vmatprep.subr.bf16.mxu0 %v959_v36  ;;  %1452 = vmatprep.subr.bf16.mxu1 %v722_v38 }
  0x5c   : > { %892 = vrot.lane.b32.xlu1 %v885_v33, %s1686_s28 }
  0x5d   : > { %890 = vrot.lane.b32.xlu0 %v873_v39, %s1686_s28 }
  0x60   : > { %924 = vrot.lane.b32.xlu1 %v917_v37, %s1685_s24 }
  0x61   : > { %922 = vrot.lane.b32.xlu0 %v914_v42, %s1685_s24 }
  0xa5   : > { %v602_v43 = vpop.permute.xlu0 %601 }
  0xa6   : > { %v600_v44 = vpop.permute.xlu1 %599 }
  0xaa   : > { %v598_v45 = vpop.permute.xlu1 %597 }
  0xab   : > { %v596_v46 = vpop.permute.xlu0 %595 }
  0xae   : > { %v441_v47 = vpop.permute.xlu1 %440 }
  0xaf   : > { %v439_v51 = vpop.permute.xlu0 %438 }
  0xb2   : > { %v564_v52 = vpop.permute.xlu1 %563 }
  0xb3   : > { %v604_v54 = vsel %vm446_vm6, %v1860_v49, %v564_v52  ;;  %v568_v55 = vpop.permute.xlu0 %567 }
  0xb4   : > { %v612_v56 = vsel %vm455_vm7, %v604_v54, %v596_v46  ;;  %v608_v60 = vsel %vm446_vm6, %v1858_v48, %v568_v55 }
  0xb5   : > { %1444 = vmatprep.mubr.msk.bf16.mxu0 %vm627_vm8, %v612_v56  ;;  %v616_v61 = vsel %vm455_vm7, %v608_v60, %v600_v44 }
  0xb6   : > { %v566_v62 = vpop.permute.xlu1 %565  ;;  %1448 = vmatprep.mubr.msk.bf16.mxu1 %vm627_vm8, %v616_v61 }
  0xb7   : > { %v606_v1 = vsel %vm446_vm6, %v1867_v58, %v566_v62  ;;  %v570_v2 = vpop.permute.xlu0 %569 }
  0xb8   : > { %v614_v3 = vsel %vm455_vm7, %v606_v1, %v598_v45  ;;  %v610_v49 = vsel %vm446_vm6, %v1865_v57, %v570_v2 }
  0xb9   : > { %1445 = vmatmul.mubr.msk.bf16.vlgmr.msra.gmra.mxu0 %vm627_vm8, %v614_v3  ;;  %v618_v48 = vsel %vm455_vm7, %v610_v49, %v602_v43 }
  0xba   : > { %v408_v4 = vpop.permute.xlu1 %407  ;;  %1463 = vmatpush3.bf16.msra.mxu0 %v959_v36  ;;  %1449 = vmatmul.mubr.msk.bf16.vlgmr.msra.gmra.mxu1 %vm627_vm8, %v618_v48 }
  0xbb   : > { %v406_v6 = vpop.permute.xlu0 %405  ;;  %1453 = vmatpush3.bf16.msra.mxu1 %v722_v38  ;;  %v450_v9 = vsel %vm446_vm6, %v1872_v0, %v408_v4 }
  0xbc   : > { %v448_v7 = vsel %vm446_vm6, %v1875_v5, %v406_v6  ;;  %v459_v10 = vsel %vm455_vm7, %v450_v9, %v441_v47 }
  0xbd   : > { %v457_v58 = vsel %vm455_vm7, %v448_v7, %v439_v51 }
  0xbe   : > { %v889_v8 = vpop.permute.xlu1 %888  ;;  %1454 = vmatprep.mubr.msk.bf16.mxu1 %vm627_vm8, %v457_v58 }
  0xbf   : > { %v887_v57 = vpop.permute.xlu0 %886  ;;  %v929_v12 = vsel %vm446_vm6, %v1902_v50, %v889_v8 }
  0xc0   : > { %v927_v5 = vsel %vm446_vm6, %v1911_v63, %v887_v57 }
  0xc2   : > { %v921_v11 = vpop.permute.xlu1 %920  ;;  %1455 = vmatmul.mubr.msk.bf16.vlgmr.msra.gmra.mxu1 %vm627_vm8, %v459_v10 }
  0xc3   : > { %v937_v13 = vsel %vm455_vm7, %v929_v12, %v921_v11  ;;  %v919_v14 = vpop.permute.xlu0 %918 }
  0xc4   : > { %v935_v15 = vsel %vm455_vm7, %v927_v5, %v919_v14 }
  0xc5   : > { %1464 = vmatprep.mubr.msk.bf16.mxu0 %vm627_vm8, %v935_v15 }
  0xc6   : > { %v412_v0 = vpop.permute.xlu1 %411  ;;  %1465 = vmatmul.mubr.msk.bf16.vlgmr.msra.gmra.mxu0 %vm627_vm8, %v937_v13 }
  0xc7   : > { %v410_v16 = vpop.permute.xlu0 %409  ;;  %v454_v50 = vsel %vm446_vm6, %v1926_v25, %v412_v0 }
  0xc8   : > { %v452_v18 = vsel %vm446_vm6, %v1929_v27, %v410_v16 }
  0xca   : > { %v445_v17 = vpop.permute.xlu1 %444 }
  0xcb   : > { %v463_v63 = vsel %vm455_vm7, %v454_v50, %v445_v17  ;;  %v443_v19 = vpop.permute.xlu0 %442 }
  0xcc   : > { %v461_v20 = vsel %vm455_vm7, %v452_v18, %v443_v19 }
  0xcd   : > { %1458 = vmatprep.mubr.msk.bf16.mxu1 %vm627_vm8, %v461_v20 }
  0xce   : > { %v893_v21 = vpop.permute.xlu1 %892  ;;  %1459 = vmatmul.mubr.msk.bf16.gmra.mxu1 %vm627_vm8, %v463_v63 }
  0xcf   : > { %v891_v22 = vpop.permute.xlu0 %890  ;;  %v933_v24 = vsel %vm446_vm6, %v1948_v53, %v893_v21 }
  0xd0   : > { %v931_v25 = vsel %vm446_vm6, %v1951_v59, %v891_v22 }
  0xd2   : > { %v925_v23 = vpop.permute.xlu1 %924 }
  0xd3   : > { %v941_v27 = vsel %vm455_vm7, %v933_v24, %v925_v23  ;;  %v923_v26 = vpop.permute.xlu0 %922 }
  0xd4   : > { %v939_v28 = vsel %vm455_vm7, %v931_v25, %v923_v26 }
  0xd5   : > { %1468 = vmatprep.mubr.msk.bf16.mxu0 %vm627_vm8, %v939_v28 }
  0xd6   : > { %1469 = vmatmul.mubr.msk.bf16.gmra.mxu0 %vm627_vm8, %v941_v27 }
 0x179   : > { %v1446_v29 = vpop.f32.mrf.mxu0 }
 0x17a   : > { %v1450_v30 = vpop.f32.mrf.mxu1 }
 0x17b   : > { %v677_v31 = vpop.f32.mrf.mxu0 }
 0x17c   : > { %v693_v32 = vpop.f32.mrf.mxu1 }
 0x17d   : > { %v1447_v34 = vpop.f32.mrf.mxu0 }
 0x17e   : > { %v1451_v33 = vpop.f32.mrf.mxu1 }
 0x17f   : > { %v680_v36 = vpop.f32.mrf.mxu0 }
 0x180   : > { %v696_v35 = vpop.f32.mrf.mxu1 }
 0x182   : > { %v1456_v53 = vpop.f32.mrf.mxu1 }
 0x183   : > { %v767_v38 = vadd.f32 %v1456_v53, %v1446_v29 }
 0x184   : > { %v758_v59 = vpop.f32.mrf.mxu1 }
 0x185   : > { %v759_v37 = vadd.f32 %v758_v59, %v677_v31 }
 0x186   : > { %v1457_v39 = vpop.f32.mrf.mxu1  ;;  %v1466_v40 = vpop.f32.mrf.mxu0 }
 0x187   : > { %v1028_v42 = vadd.f32 %v1466_v40, %v767_v38  ;;  %v770_v44 = vadd.f32 %v1457_v39, %v1447_v34 }
 0x188   : > { %v995_v43 = vpop.f32.mrf.mxu0  ;;  %v761_v46 = vpop.f32.mrf.mxu1 }
 0x189   : > { %v1043_v45 = vadd.f32 %v2039_v41, %v1028_v42  ;;  %v1026_v47 = vadd.f32 %v995_v43, %v759_v37  ;;  %v762_v54 = vadd.f32 %v761_v46, %v680_v36 }
 0x18a   : > { %v1467_v51 = vpop.f32.mrf.mxu0 }
 0x18b   : > { %v1029_v52 = vadd.f32 %v1467_v51, %v770_v44  ;;  %v1041_v55 = vadd.f32 %v2039_v41, %v1026_v47  ;;  %v1059_v60 = vmul.f32 0.01, %v1043_v45  ;;  %vm1051_vm9 = vcmp.ge.f32.partialorder %v1043_v45, 0.0 }
 0x18c   : > { %v998_v56 = vpop.f32.mrf.mxu0 }
 0x18d   : > { %v1044_v61 = vadd.f32 %v2039_v41, %v1029_v52  ;;  %v1027_v62 = vadd.f32 %v998_v56, %v762_v54  ;;  %v1057_v3 = vmul.f32 0.01, %v1041_v55  ;;  %v1067_v4 = vsel %vm1051_vm9, %v1043_v45, %v1059_v60 }
 0x18e   : > { %v1460_v1 = vpop.f32.mrf.mxu1  ;;  %vm1049_vm11 = vcmp.ge.f32.partialorder %v1041_v55, 0.0  ;;  %v1128_v23 = vmul.f32 %v1067_v4, %v1067_v4 }
 0x18f   : > { %vm1052_vm10 = vcmp.ge.f32.partialorder %v1044_v61, 0.0  ;;  %v1060_v2 = vmul.f32 0.01, %v1044_v61  ;;  %v1042_v49 = vadd.f32 %v2039_v41, %v1027_v62  ;;  %v1065_v8 = vsel %vm1049_vm11, %v1041_v55, %v1057_v3 }
 0x190   : > { %v774_v48 = vpop.f32.mrf.mxu1  ;;  %v783_v11 = vadd.f32 %v1460_v1, %v1450_v30  ;;  %v1126_v15 = vmul.f32 %v1065_v8, %v1065_v8 }
 0x191   : > { %v1068_v6 = vsel %vm1052_vm10, %v1044_v61, %v1060_v2  ;;  %vm1050_vm12 = vcmp.ge.f32.partialorder %v1042_v49, 0.0  ;;  %v1058_v58 = vmul.f32 0.01, %v1042_v49  ;;  %v775_v13 = vadd.f32 %v774_v48, %v693_v32 }
 0x192   : > { %v1412_v7 = vpack.c.bf16 %v1068_v6, %v1067_v4  ;;  %v1461_v57 = vpop.f32.mrf.mxu1  ;;  %v1129_v32 = vmul.f32 %v1068_v6, %v1068_v6 }
 0x193   : > { %v1066_v9 = vsel %vm1050_vm12, %v1042_v49, %v1058_v58  ;;  %v786_v63 = vadd.f32 %v1461_v57, %v1451_v33 }
 0x194   : > { %1424 = vst [vmem:[%s2048_s10 + $0x8] sm:$0xff] %v1412_v7   ;;  %v1407_v10 = vpack.c.bf16 %v1066_v9, %v1065_v8  ;;  %v1127_v12 = vmul.f32 %v1066_v9, %v1066_v9  ;;  %v1113_v0 = vadd.f32 %v1066_v9, %v1065_v8  ;;  %v777_v16 = vpop.f32.mrf.mxu1 }
 0x195   : > { %v778_v21 = vadd.f32 %v777_v16, %v696_v35 }
 0x196   : > { %v1470_v5 = vpop.f32.mrf.mxu0  ;;  %1408 = vst [vmem:[%s2048_s10] sm:$0xff] %v1407_v10   ;;  %v1134_v18 = vadd.f32 %v1127_v12, %v1126_v15  ;;  %v1114_v24 = vadd.f32 %v1113_v0, %v1067_v4 }
 0x197   : > { %v1032_v14 = vadd.f32 %v1470_v5, %v783_v11 }
 0x198   : > { %v1011_v17 = vpop.f32.mrf.mxu0  ;;  %v1135_v29 = vadd.f32 %v1134_v18, %v1128_v23  ;;  %v1115_v53 = vadd.f32 %v1114_v24, %v1068_v6 }
 0x199   : > { %v1030_v50 = vadd.f32 %v1011_v17, %v775_v13  ;;  %v1047_v19 = vadd.f32 %v2039_v41, %v1032_v14 }
 0x19a   : > { %v1471_v20 = vpop.f32.mrf.mxu0  ;;  %v1136_v40 = vadd.f32 %v1135_v29, %v1129_v32 }
 0x19b   : > { %v1045_v22 = vadd.f32 %v2039_v41, %v1030_v50  ;;  %v1033_v25 = vadd.f32 %v1471_v20, %v786_v63  ;;  %v1063_v30 = vmul.f32 0.01, %v1047_v19  ;;  %vm1055_vm14 = vcmp.ge.f32.partialorder %v1047_v19, 0.0 }
 0x19c   : > { %v1014_v27 = vpop.f32.mrf.mxu0 }
 0x19d   : > { %vm1053_vm13 = vcmp.ge.f32.partialorder %v1045_v22, 0.0  ;;  %v1061_v26 = vmul.f32 0.01, %v1045_v22  ;;  %v1031_v28 = vadd.f32 %v1014_v27, %v778_v21  ;;  %v1048_v31 = vadd.f32 %v2039_v41, %v1033_v25 }
 0x19e   : > { %v1071_v38 = vsel %vm1055_vm14, %v1047_v19, %v1063_v30 }
 0x19f   : > { %v1069_v33 = vsel %vm1053_vm13, %v1045_v22, %v1061_v26  ;;  %v1046_v34 = vadd.f32 %v2039_v41, %v1031_v28  ;;  %vm1056_vm15 = vcmp.ge.f32.partialorder %v1048_v31, 0.0  ;;  %v1064_v36 = vmul.f32 0.01, %v1048_v31 }
 0x1a0   : > { %v1130_v35 = vmul.f32 %v1069_v33, %v1069_v33  ;;  %v1116_v39 = vadd.f32 %v1115_v53, %v1069_v33  ;;  %v1132_v41 = vmul.f32 %v1071_v38, %v1071_v38 }
 0x1a1   : > { %vm1054_vm0 = vcmp.ge.f32.partialorder %v1046_v34, 0.0  ;;  %v1062_v59 = vmul.f32 0.01, %v1046_v34  ;;  %v1072_v37 = vsel %vm1056_vm15, %v1048_v31, %v1064_v36 }
 0x1a2   : > { %v1422_v42 = vpack.c.bf16 %v1072_v37, %v1071_v38  ;;  %v1137_v44 = vadd.f32 %v1136_v40, %v1130_v35  ;;  %v1133_v54 = vmul.f32 %v1072_v37, %v1072_v37 }
 0x1a3   : > { %v1070_v43 = vsel %vm1054_vm0, %v1046_v34, %v1062_v59 }
 0x1a4   : > { %v1417_v45 = vpack.c.bf16 %v1070_v43, %v1069_v33  ;;  %v1117_v46 = vadd.f32 %v1116_v39, %v1070_v43  ;;  %v1131_v47 = vmul.f32 %v1070_v43, %v1070_v43  ;;  %1426 = vst [vmem:[%s2048_s10 + $0x18] sm:$0xff] %v1422_v42  }
 0x1a6   : > { %1425 = vst [vmem:[%s2048_s10 + $0x10] sm:$0xff] %v1417_v45   ;;  %v1118_v51 = vadd.f32 %v1117_v46, %v1071_v38  ;;  %v1138_v52 = vadd.f32 %v1137_v44, %v1131_v47 }
 0x1a8   : > { %v1119_v55 = vadd.f32 %v1118_v51, %v1072_v37  ;;  %v1139_v56 = vadd.f32 %v1138_v52, %v1132_v41 }
 0x1aa   : > { %v1120_v60 = vrot.slane %v1119_v55, 4  ;;  %v1140_v61 = vadd.f32 %v1139_v56, %v1133_v54 }
 0x1ac   : > { %v1121_v62 = vadd.f32 %v1120_v60, %v1119_v55  ;;  %v1141_v1 = vrot.slane %v1140_v61, 4 }
 0x1ae   : > { %v1122_v2 = vrot.slane %v1121_v62, 2  ;;  %v1142_v3 = vadd.f32 %v1141_v1, %v1140_v61 }
 0x1b0   : > { %v1123_v49 = vadd.f32 %v1122_v2, %v1121_v62  ;;  %v1143_v48 = vrot.slane %v1142_v3, 2 }
 0x1b2   : > { %v1124_v4 = vrot.slane %v1123_v49, 1  ;;  %v1144_v6 = vadd.f32 %v1143_v48, %v1142_v3  ;;  %1150 = sbr.rel (%p1386_p0) target bundleno = 441 (0x1b9), region = 36 }
 0x1b4   : > { %v1125_v7 = vadd.f32 %v1124_v4, %v1123_v49  ;;  %v1145_v58 = vrot.slane %v1144_v6, 1 }
 0x1b6   : > { %v1146_v8 = vadd.f32 %v1145_v58, %v1144_v6 }
 0x1b7   : > { %1151 = vst [vmem:[%s1799_s17] sm:$0x1] %v1125_v7 }
 0x1b8   : > { %1152 = vst [vmem:[%s1804_s8] sm:$0x1] %v1146_v8 }
 0x1b9 PF: > { %p1387_p1 = scmp.le.s32.totalorder %s1667_s21, 0 }
 0x1bb   : > { %1156 = sbr.rel (%p1387_p1) target bundleno = 453 (0x1c5), region = 40 }
 0x1c0   : > { %v1157_v9 = vld [vmem:[%s1799_s17] sm:$0x1] }
 0x1c1   : > { %v1160_v57 = vld [vmem:[%s1804_s8] sm:$0x1]  ;;  %v1158_v10 = vadd.f32 %v1157_v9, %v1125_v7 }
 0x1c2   : > { %v1161_v11 = vadd.f32 %v1160_v57, %v1146_v8 }
 0x1c3   : > { %1159 = vst [vmem:[%s1799_s17] sm:$0x1] %v1158_v10 }
 0x1c4   : > { %1162 = vst [vmem:[%s1804_s8] sm:$0x1] %v1161_v11 }
 0x1c5 PF: > { %s1403_s24 = sshll.u32 %s1667_s21, 3  ;;  %s1391_s28 = sshll.u32 %s1671_s22, 5 }
 0x1c6   : > { %s1186_s29 = sshll.u32 %s2048_s10, 4  ;;  %s1183_s12 = sadd.s32 %s1403_s24, %s1391_s28  ;;  %s2069_s29 = int_to_ptr.vmem [resolvable:$true] %s1186_s29 }
 0x1c7   : > { %s1392_s13 = sshll.u32 %s1183_s12, 6  ;;  %s2078_s8 = scalar_lea.sflag [#allocation4], %s240_s30 }
 0x1c8   : > { %s2074_s17 = scalar_lea.hbm %s2132_s3, %s1392_s13  ;;  %s1591_s16 = scalar_lea.vmem %s2069_s29, 512 }
 0x1c9   : > { %p1592_p2 = scmp.ne.s32.totalorder %s2069_s29, %s1591_s16  ;;  %s1688_s21 = smov [#allocation3]  }
 0x1ca   : > { %s1595_s22 = sshll.u32 %s1688_s21, 4  ;;  %s1596_s22 = int_to_ptr.vmem [resolvable:$false] %s1595_s22 }
 0x1cb   : > { %p1593_p4 = pnand %p1592_p2, %p1772_p3  ;;  %s1597_s26 = scalar_lea.vmem %s1596_s22, 1024 }
 0x1cc   : > { %p1598_p6 = scmp.lt.s32.totalorder %s2069_s29, %s1596_s22  ;;  %p1599_p7 = scmp.lt.s32.totalorder %s1597_s26, %s1591_s16 }
 0x1cd   : > { %p1594_p5 = pneg %p1593_p4 }
 0x1ce   : > { %p1600_p9 = por %p1599_p7, %p1598_p6 }
 0x1d0   : > { %p1601_p10 = pnand %p1600_p9, %p1594_p5 }
 0x1d2   : > { %1604 = shalt.err (!%p1601_p10)
}
 0x1d3   : > { %s1605_s27 = scalar_lea.hbm %s2074_s17, 512  ;;  %s1609_s10 = scalar_lea.hbm %s2132_s3, 4096 }
 0x1d4   : > { %p1606_p11 = scmp.ne.s32.totalorder %s2074_s17, %s1605_s27  ;;  %p1610_p0 = scmp.lt.s32.totalorder %s2074_s17, %s2132_s3 }
 0x1d5   : > { %p1611_p1 = scmp.lt.s32.totalorder %s1609_s10, %s1605_s27 }
 0x1d6   : > { %p1607_p12 = pnand %p1606_p11, %p1772_p3 }
 0x1d7   : > { %p1612_p2 = por %p1611_p1, %p1610_p0 }
 0x1d8   : > { %p1608_p13 = pneg %p1607_p12 }
 0x1da   : > { %p1613_p4 = pnand %p1612_p2, %p1608_p13 }
 0x1dc   : > { %1616 = shalt.err (!%p1613_p4)
}
 0x1dd   : > { %s1689_s12 = smov 64   ;;  %s1690_s13 = smov 4  }
 0x1de   : > { %1476 = dma.vmem_to_hbm [thread:$0]  (%p1772_p3), %s2069_s29, 512, %s2074_s17, %s2078_s8, %s1689_s12, %s1689_s12, %s1690_s13  }
 0x1df PF: > { %p1482_p5 = scmp.ge.s32.totalorder %s1683_s25, 2  ;;  %s1207_s14 = sand.u32 1, %s1655_s18  }
 0x1e0   : > { %s1208_s15 = scalar_lea.sflag [#allocation4], %s1207_s14 }
 0x1e1   : > { %p1479_p6 = pnand %p1482_p5, %p1781_p8 }
 0x1e3   : > { %p1480_p7 = pneg %p1479_p6 }
 0x1e5   : > { %1650 = dma.done.wait (%p1480_p7), %s1208_s15, 512  }
 0x1e6   : > { %1652 = vsyncadd (%p1480_p7), %s1208_s15, 4294966784  ;;  %s19_s25 = sadd.s32 1, %s1683_s25   ;;  %s2143_s22 = sld [smem:[#allocation6_spill]] }
 0x1e7   : > { %p16_p9 = scmp.ge.s32.totalorder %s19_s25, 10   ;;  %s2144_s6 = sld [smem:[#allocation7_spill]] }
 0x1e8   : > { %s2145_s24 = sld [smem:[#allocation8_spill]]  ;;  %s2146_s18 = smov %s1659_s19 }
 0x1e9   : > { %s2147_s19 = smov %s1663_s20  ;;  %s2148_s20 = smov %s1790_s11 }
 0x1ea   : > { %s2149_s21 = smov %s1675_s23  ;;  %18 = sbr.rel (!%p16_p9) target bundleno = 5 (0x5), region = 103 }
 0x1ed   : > { %s2150_s23 = smov %s2144_s6 }
 0x1ef   :  { %1225 = vsyncpa [#allocation4], 1 }
 0x1f0   :  { %1227 = vsyncpa [#allocation4 + $0x1], 1 }

</bundles_post_ra>
